<compile_context>
chip_gen: v7x
topology: tpu7x:2x2x1
jax: 0.10.0
libtpu: 0.0.40
codegen_flags: <defaults>
</compile_context>

<pallas_src>
import jax
import jax.numpy as jnp
from jax.experimental import pallas as pl
from jax.experimental.pallas import tpu as pltpu


def _round_up(x, m):
    return ((x + m - 1) // m) * m


def _patch_embed_kernel(p_ref, w_ref, b_ref, o_ref):
    # p_ref: (TM, Kp) patch tile; w_ref: (Kp, Ep) weight; b_ref: (1, Ep) bias.
    acc = jnp.dot(p_ref[...], w_ref[...], preferred_element_type=jnp.float32)
    o_ref[...] = (acc + b_ref[...]).astype(o_ref.dtype)


def patch_embed(x, weight, bias, patch_size, *, compute_dtype=None):
    """x: (B, C, H, W) NCHW; weight: (E, C, P, P) OIHW; bias: (E,).
    Returns (B, N, E) with N = (H//P)*(W//P).

    compute_dtype: optionally cast activations/weights (e.g. jnp.bfloat16) for
    ~2x MXU throughput on v6e/v7x; accumulation stays f32."""
    B, C, H, W = x.shape
    E = weight.shape[0]
    P = patch_size
    assert H % P == 0 and W % P == 0, "spatial dims must be divisible by patch"
    nh, nw = H // P, W // P
    N = nh * nw
    K = C * P * P
    M = B * N

    out_dtype = x.dtype
    if compute_dtype is not None:
        x = x.astype(compute_dtype)
        weight = weight.astype(compute_dtype)

    # --- glue: patch extraction (pure layout rearrangement) ---
    # (B, C, nh, P, nw, P) -> (B, nh, nw, C, P, P) -> (B*N, C*P*P)
    patches = x.reshape(B, C, nh, P, nw, P)
    patches = jnp.transpose(patches, (0, 2, 4, 1, 3, 5))
    patches = patches.reshape(M, K)
    # conv weight (E, C, P, P) -> (K, E): same (c, kh, kw) flattening order.
    w_mat = jnp.transpose(weight.reshape(E, K), (1, 0))

    # --- pad K / E to lane multiples (128) so stores are unmasked and the
    #     MXU is fully fed; zero padding does not change the dot product. ---
    LANE = 128
    Kp = _round_up(K, LANE)
    Ep = _round_up(E, LANE)

    # --- choose M tile: big enough to hide DMA / amortize per-step grid
    #     overhead, small enough that double-buffered tiles + the resident
    #     (Kp, Ep) weight fit the conservative 32 MiB scoped-VMEM budget
    #     (valid on v5e/v6e and v7x's smaller 64 MiB VMEM). ---
    bytes_per = jnp.dtype(patches.dtype).itemsize
    vmem_budget = 32 * 1024 * 1024
    TM = 512
    while TM > 8:
        need = 2 * TM * (Kp + Ep) * bytes_per + Kp * Ep * bytes_per
        if need <= vmem_budget:
            break
        TM //= 2
    TM = max(8, min(TM, _round_up(M, 8)))
    Mp = _round_up(M, TM)

    if Mp != M or Kp != K:
        patches = jnp.pad(patches, ((0, Mp - M), (0, Kp - K)))
    if Kp != K or Ep != E:
        w_mat = jnp.pad(w_mat, ((0, Kp - K), (0, Ep - E)))
    b_mat = jnp.pad(bias, (0, Ep - E)).reshape(1, Ep).astype(jnp.float32)

    out = pl.pallas_call(
        _patch_embed_kernel,
        out_shape=jax.ShapeDtypeStruct((Mp, Ep), out_dtype),
        grid_spec=pltpu.PrefetchScalarGridSpec(
            num_scalar_prefetch=0,
            grid=(Mp // TM,),
            in_specs=[
                pl.BlockSpec((TM, Kp), lambda i: (i, 0)),   # streaming patches
                pl.BlockSpec((Kp, Ep), lambda i: (0, 0)),   # resident weight
                pl.BlockSpec((1, Ep), lambda i: (0, 0)),    # resident bias
            ],
            out_specs=pl.BlockSpec((TM, Ep), lambda i: (i, 0)),
        ),
        compiler_params=pltpu.CompilerParams(
            dimension_semantics=("parallel",),      # megacore split on v7x
            vmem_limit_bytes=64 * 1024 * 1024,
        ),
    )(patches, w_mat, b_mat)

    # slice off padding; (B*N, E) -> (B, N, E) == flatten(2,-1).transpose(1,2)
    return out[:M, :E].reshape(B, N, E)


def reference_patch_embed(x, weight, bias, patch_size):
    """Pure-JAX reference using lax.conv (NCHW, OIHW) for validation."""
    y = jax.lax.conv_general_dilated(
        x, weight,
        window_strides=(patch_size, patch_size),
        padding="VALID",
        dimension_numbers=("NCHW", "OIHW", "NCHW"),
    )
    y = y + bias.reshape(1, -1, 1, 1)
    B, E, nh, nw = y.shape
    return jnp.transpose(y.reshape(B, E, nh * nw), (0, 2, 1))


if __name__ == "__main__":
    # Small config consistent with the module: in_channels=4, patch_size=4,
    # embed_dim=32, input spatial 16x16, batch 2.
    B, C, H, W = 2, 4, 16, 16
    P = 4
    E = 32

    key = jax.random.PRNGKey(0)
    kx, kw, kb = jax.random.split(key, 3)
    x = jax.random.normal(kx, (B, C, H, W), dtype=jnp.float32)
    weight = jax.random.normal(kw, (E, C, P, P), dtype=jnp.float32) * 0.02
    bias = jax.random.normal(kb, (E,), dtype=jnp.float32) * 0.02

    out = patch_embed(x, weight, bias, P)
    out = jax.block_until_ready(out)

    ref = reference_patch_embed(x, weight, bias, P)
    assert out.shape == (B, (H // P) * (W // P), E), out.shape
    assert jnp.allclose(out, ref, atol=1e-4, rtol=1e-4), "mismatch vs reference"

    print("KERNEL_OK")
</pallas_src>

<mosaic_0001>
module attributes {stable_mosaic.version = 11 : i64} {
  func.func @_patch_embed_kernel(%arg0: i32, %arg1: memref<32x128xf32, #tpu.memory_space<vmem>>, %arg2: memref<128x128xf32, #tpu.memory_space<vmem>>, %arg3: memref<1x128xf32, #tpu.memory_space<vmem>>, %arg4: memref<32x128xf32, #tpu.memory_space<vmem>>) attributes {dimension_semantics = [#tpu.dimension_semantics<parallel>], iteration_bounds = array<i64: 1>, scalar_prefetch = 0 : i64, scratch_operands = 0 : i64, tpu.core_type = #tpu.core_type<tc>, window_params = [{transform_indices = @transform_0, window_bounds = array<i64: 32, 128>}, {pipeline_mode = #tpu.pipeline_mode<synchronous>, transform_indices = @transform_1, window_bounds = array<i64: 128, 128>}, {pipeline_mode = #tpu.pipeline_mode<synchronous>, transform_indices = @transform_2, window_bounds = array<i64: 1, 128>}, {transform_indices = @transform_3, window_bounds = array<i64: 32, 128>}]} {
    %c0 = arith.constant 0 : index
    %c0_0 = arith.constant 0 : index
    %0 = vector.load %arg1[%c0, %c0_0] : memref<32x128xf32, #tpu.memory_space<vmem>>, vector<32x128xf32>
    %c0_1 = arith.constant 0 : index
    %c0_2 = arith.constant 0 : index
    %1 = vector.load %arg2[%c0_1, %c0_2] : memref<128x128xf32, #tpu.memory_space<vmem>>, vector<128x128xf32>
    %cst = arith.constant dense<0.000000e+00> : vector<32x128xf32>
    %2 = tpu.matmul %0, %1, %cst {dimension_numbers = #tpu.dot_dimension_numbers<[1], [0], [0], [1], [0, 0, 1, 1], [], []>} : vector<32x128xf32>, vector<128x128xf32>, vector<32x128xf32> -> vector<32x128xf32>
    %c0_3 = arith.constant 0 : index
    %c0_4 = arith.constant 0 : index
    %3 = vector.load %arg3[%c0_3, %c0_4] : memref<1x128xf32, #tpu.memory_space<vmem>>, vector<1x128xf32>
    %4 = vector.broadcast %3 : vector<1x128xf32> to vector<32x128xf32>
    %5 = arith.addf %2, %4 : vector<32x128xf32>
    %c0_5 = arith.constant 0 : index
    %c0_6 = arith.constant 0 : index
    %6 = vector.load %arg4[%c0_5, %c0_6] : memref<32x128xf32, #tpu.memory_space<vmem>>, vector<32x128xf32>
    tpu.vector_store %arg4[%c0_5, %c0_6], %5 {strides = array<i32>} : memref<32x128xf32, #tpu.memory_space<vmem>>, vector<32x128xf32>,
    return
  }
  func.func @transform_0(%arg0: i32) -> (i32, i32) {
    %c0_i32 = arith.constant 0 : i32
    %c0_i32_0 = arith.constant 0 : i32
    return %arg0, %c0_i32 : i32, i32
  }
  func.func @transform_1(%arg0: i32) -> (i32, i32) {
    %c0_i32 = arith.constant 0 : i32
    %c0_i32_0 = arith.constant 0 : i32
    %c0_i32_1 = arith.constant 0 : i32
    return %c0_i32, %c0_i32_0 : i32, i32
  }
  func.func @transform_2(%arg0: i32) -> (i32, i32) {
    %c0_i32 = arith.constant 0 : i32
    %c0_i32_0 = arith.constant 0 : i32
    %c0_i32_1 = arith.constant 0 : i32
    return %c0_i32, %c0_i32_0 : i32, i32
  }
  func.func @transform_3(%arg0: i32) -> (i32, i32) {
    %c0_i32 = arith.constant 0 : i32
    %c0_i32_0 = arith.constant 0 : i32
    return %arg0, %c0_i32 : i32, i32
  }
}

</mosaic_0001>

<bundles_post_ra>
// kernel: tpu_custom_call.1
= control target key start
LH: loop header
LB: loop body
LE: loop exit
PB: predicated region body
PF: predicated region fallthrough
CT: control target
= control target key end

     0   :  { %8 = vsyncpa [#allocation3], 0  ;;  %s485_s0 = inlined_call_operand.hbm [shape: f32[32,128], index: 0, kind: input, shape index: {}]   ;;  %s486_s1 = inlined_call_operand.hbm [shape: f32[128,128], index: 1, kind: input, shape index: {}]   ;;  %s487_s2 = inlined_call_operand.hbm [shape: f32[1,128], index: 2, kind: input, shape index: {}]   ;;  %s488_s3 = inlined_call_operand.hbm [shape: f32[32,128], index: 3, kind: output, shape index: {}]  }
   0x1   :  { %9 = vsyncpa [#allocation6], 0 }
   0x2   :  { %10 = vsyncpa [#allocation4], 0  ;;  %s395_s12 = smov [#allocation5]   ;;  %s396_s14 = smov [#allocation2]  }
   0x3   :  { %s28_s13 = sshll.u32 %s395_s12, 4  ;;  %s16_s15 = sshll.u32 %s396_s14, 4  ;;  %s29_s13 = int_to_ptr.vmem [resolvable:$true] %s28_s13  ;;  %s421_s15 = int_to_ptr.vmem [resolvable:$true] %s16_s15 }
   0x4   :  { %s301_s18 = scalar_lea.hbm %s486_s1, 2048 }
   0x5   :  { %p302_p0 = scmp.ne.s32.totalorder %s486_s1, %s301_s18  ;;  %p305_p1 = scmp.lt.u32.totalorder %s301_s18, %s486_s1 }
   0x7   :  { %p307_p2 = pnand %p305_p1, %p302_p0 }
   0x9   :  { %310 = shalt.err (!%p307_p2)
}
   0xa   :  { %s311_s23 = scalar_lea.vmem %s29_s13, 2048  ;;  %p316_p4 = scmp.lt.s32.totalorder %s29_s13, %s29_s13 }
   0xb   :  { %p312_p3 = scmp.ne.s32.totalorder %s29_s13, %s311_s23  ;;  %p317_p5 = scmp.lt.s32.totalorder %s311_s23, %s311_s23 }
   0xd   :  { %p318_p6 = por %p317_p5, %p316_p4 }
   0xf   :  { %p319_p7 = pnand %p318_p6, %p312_p3 }
  0x11   :  { %322 = shalt.err (!%p319_p7)
}
  0x12   :  { %s397_s24 = smov 128   ;;  %s398_s25 = smov 8  }
  0x13   :  { %34 = dma.hbm_to_vmem [thread:$0]  %s486_s1, 2048, %s29_s13, [#allocation6], %s397_s24, %s397_s24, %s398_s25  }
  0x14   :  { %s323_s30 = scalar_lea.hbm %s485_s0, 512 }
  0x15   :  { %p324_p8 = scmp.ne.s32.totalorder %s485_s0, %s323_s30  ;;  %p327_p9 = scmp.lt.u32.totalorder %s323_s30, %s485_s0 }
  0x17   :  { %p329_p10 = pnand %p327_p9, %p324_p8 }
  0x19   :  { %332 = shalt.err (!%p329_p10)
}
  0x1a   :  { %s333_s8 = scalar_lea.vmem %s421_s15, 512  ;;  %p338_p12 = scmp.lt.s32.totalorder %s421_s15, %s421_s15 }
  0x1b   :  { %p334_p11 = scmp.ne.s32.totalorder %s421_s15, %s333_s8  ;;  %p339_p13 = scmp.lt.s32.totalorder %s333_s8, %s333_s8 }
  0x1d   :  { %p340_p0 = por %p339_p13, %p338_p12 }
  0x1f   :  { %p341_p1 = pnand %p340_p0, %p334_p11 }
  0x21   :  { %344 = shalt.err (!%p341_p1)
}
  0x22   :  { %22 = dma.hbm_to_vmem [thread:$0]  %s485_s0, 512, %s421_s15, [#allocation3], %s397_s24, %s397_s24, %s398_s25  }
  0x23   :  { %s399_s10 = smov [#allocation7]   ;;  %s345_s14 = scalar_lea.hbm %s487_s2, 16 }
  0x24   :  { %s41_s11 = sshll.u32 %s399_s10, 4  ;;  %p346_p2 = scmp.ne.s32.totalorder %s487_s2, %s345_s14  ;;  %s42_s11 = int_to_ptr.vmem [resolvable:$true] %s41_s11 }
  0x25   :  { %p349_p3 = scmp.lt.u32.totalorder %s345_s14, %s487_s2 }
  0x27   :  { %p351_p4 = pnand %p349_p3, %p346_p2 }
  0x29   :  { %354 = shalt.err (!%p351_p4)
}
  0x2a   :  { %s355_s20 = scalar_lea.vmem %s42_s11, 16  ;;  %s359_s0 = scalar_lea.vmem %s42_s11, 32 }
  0x2b   :  { %p356_p5 = scmp.ne.s32.totalorder %s42_s11, %s355_s20  ;;  %p360_p6 = scmp.lt.s32.totalorder %s42_s11, %s42_s11 }
  0x2c   :  { %p361_p7 = scmp.lt.s32.totalorder %s359_s0, %s355_s20 }
  0x2e   :  { %p362_p8 = por %p361_p7, %p360_p6 }
  0x30   :  { %p363_p9 = pnand %p362_p8, %p356_p5 }
  0x32   :  { %366 = shalt.err (!%p363_p9)
}
  0x33   :  { %44 = dma.hbm_to_vmem [thread:$0]  %s487_s2, 16, %s42_s11, [#allocation6]  }
  0x34   :  { %389 = dma.done.wait [#allocation3], 512  }
  0x35   :  { %390 = vsyncadd [#allocation3], 4294966784 }
  0x36   :  { %391 = dma.done.wait [#allocation6], 2064  }
  0x37   :  { %392 = vsyncadd [#allocation6], 4294965232  ;;  %v58_v0 = vld [vmem:[#allocation5] sm:$0xff]  ;;  %v59_v1 = vld [vmem:[#allocation5 + $0x8] sm:$0xff]  ;;  %s400_s2 = smov [#allocation8]  }
  0x38   :  { %v60_v2 = vld [vmem:[#allocation5 + $0x10] sm:$0xff]  ;;  %v247_v3 = vpack.c.bf16 %v59_v1, %v58_v0  ;;  %v61_v4 = vld [vmem:[#allocation5 + $0x18] sm:$0xff]  ;;  %v62_v6 = vld [vmem:[#allocation5 + $0x20] sm:$0xff]  ;;  %s175_s22 = sshll.u32 %s400_s2, 4  ;;  %s176_s22 = int_to_ptr.vmem [resolvable:$true] %s175_s22 }
  0x39   :  { %v251_v5 = vpack.c.bf16 %v61_v4, %v60_v2  ;;  %v63_v7 = vld [vmem:[#allocation5 + $0x28] sm:$0xff]  ;;  %v54_v9 = vld [vmem:[#allocation2] sm:$0xff]  ;;  %v56_v10 = vld [vmem:[#allocation2 + $0x10] sm:$0xff]  ;;  %s367_s23 = scalar_lea.vmem %s176_s22, 512  ;;  %p372_p11 = scmp.lt.s32.totalorder %s176_s22, %s176_s22 }
  0x3a   :  { %248 = vmatprep.subr.bf16.mxu0 %v247_v3  ;;  %279 = vmatprep.subr.bf16.mxu1 %v247_v3  ;;  %v255_v8 = vpack.c.bf16 %v63_v7, %v62_v6  ;;  %v64_v11 = vld [vmem:[#allocation5 + $0x30] sm:$0xff]  ;;  %v65_v12 = vld [vmem:[#allocation5 + $0x38] sm:$0xff]  ;;  %v66_v14 = vld [vmem:[#allocation5 + $0x40] sm:$0xff]  ;;  %p368_p10 = scmp.ne.s32.totalorder %s176_s22, %s367_s23  ;;  %p373_p12 = scmp.lt.s32.totalorder %s367_s23, %s367_s23 }
  0x3b   :  { %250 = vmatpush3.bf16.msra.mxu0 %v247_v3  ;;  %287 = vmatpush3.bf16.msra.mxu1 %v247_v3  ;;  %v259_v13 = vpack.c.bf16 %v65_v12, %v64_v11  ;;  %v67_v15 = vld [vmem:[#allocation5 + $0x48] sm:$0xff]  ;;  %v68_v17 = vld [vmem:[#allocation5 + $0x50] sm:$0xff]  ;;  %v69_v18 = vld [vmem:[#allocation5 + $0x58] sm:$0xff] }
  0x3c   :  { %252 = vmatprep.subr.bf16.mxu0 %v251_v5  ;;  %280 = vmatprep.subr.bf16.mxu1 %v251_v5  ;;  %v263_v16 = vpack.c.bf16 %v67_v15, %v66_v14  ;;  %v267_v19 = vpack.c.bf16 %v69_v18, %v68_v17  ;;  %v70_v20 = vld [vmem:[#allocation5 + $0x60] sm:$0xff]  ;;  %v71_v21 = vld [vmem:[#allocation5 + $0x68] sm:$0xff]  ;;  %v72_v23 = vld [vmem:[#allocation5 + $0x70] sm:$0xff]  ;;  %p374_p13 = por %p373_p12, %p372_p11 }
  0x3d   :  { %241 = vmatprep.mubr.f32.mxu0 %v54_v9  ;;  %244 = vmatprep.mubr.f32.mxu1 %v56_v10  ;;  %v271_v22 = vpack.c.bf16 %v71_v21, %v70_v20  ;;  %v73_v24 = vld [vmem:[#allocation5 + $0x78] sm:$0xff]  ;;  %v55_v26 = vld [vmem:[#allocation2 + $0x8] sm:$0xff]  ;;  %v188_v28 = vld [vmem:[#allocation7] ss:$0 sm:$0xff] }
  0x3e   :  { %v275_v25 = vpack.c.bf16 %v73_v24, %v72_v23  ;;  %v57_v27 = vld [vmem:[#allocation2 + $0x18] sm:$0xff]  ;;  %p375_p0 = pnand %p374_p13, %p368_p10 }
  0x3f   :  { %254 = vmatpush3.bf16.msra.mxu0 %v251_v5  ;;  %288 = vmatpush3.bf16.msra.mxu1 %v251_v5 }
  0x40   :  { %256 = vmatprep.subr.bf16.mxu0 %v255_v8  ;;  %281 = vmatprep.subr.bf16.mxu1 %v255_v8 }
  0x43   :  { %258 = vmatpush3.bf16.msra.mxu0 %v255_v8  ;;  %289 = vmatpush3.bf16.msra.mxu1 %v255_v8 }
  0x44   :  { %260 = vmatprep.subr.bf16.mxu0 %v259_v13  ;;  %282 = vmatprep.subr.bf16.mxu1 %v259_v13 }
  0x47   :  { %262 = vmatpush3.bf16.msra.mxu0 %v259_v13  ;;  %290 = vmatpush3.bf16.msra.mxu1 %v259_v13 }
  0x48   :  { %264 = vmatprep.subr.bf16.mxu0 %v263_v16  ;;  %283 = vmatprep.subr.bf16.mxu1 %v263_v16 }
  0x4b   :  { %266 = vmatpush3.bf16.msra.mxu0 %v263_v16  ;;  %291 = vmatpush3.bf16.msra.mxu1 %v263_v16 }
  0x4c   :  { %268 = vmatprep.subr.bf16.mxu0 %v267_v19  ;;  %284 = vmatprep.subr.bf16.mxu1 %v267_v19 }
  0x4f   :  { %270 = vmatpush3.bf16.msra.mxu0 %v267_v19  ;;  %292 = vmatpush3.bf16.msra.mxu1 %v267_v19 }
  0x50   :  { %272 = vmatprep.subr.bf16.mxu0 %v271_v22  ;;  %285 = vmatprep.subr.bf16.mxu1 %v271_v22 }
  0x53   :  { %274 = vmatpush3.bf16.msra.mxu0 %v271_v22  ;;  %293 = vmatpush3.bf16.msra.mxu1 %v271_v22 }
  0x54   :  { %276 = vmatprep.subr.bf16.mxu0 %v275_v25  ;;  %286 = vmatprep.subr.bf16.mxu1 %v275_v25 }
  0x57   :  { %278 = vmatpush3.bf16.msra.mxu0 %v275_v25  ;;  %294 = vmatpush3.bf16.msra.mxu1 %v275_v25 }
  0x5a   :  { %242 = vmatmul.mubr.f32.vlgmr.msra.gmra.mrb[0].mxu0 %v55_v26  ;;  %245 = vmatmul.mubr.f32.vlgmr.msra.gmra.mrb[0].mxu1 %v57_v27 }
 0x12d   :  { %v243_v29 = vpop.f32.mrb[0].mxu0  ;;  %v246_v30 = vpop.f32.mrb[0].mxu1 }
 0x12e   :  { %v153_v31 = vadd.f32 %v243_v29, %v188_v28  ;;  %v163_v32 = vadd.f32 %v246_v30, %v188_v28  ;;  %v147_v33 = vpop.f32.mrb[1].mxu0  ;;  %v157_v34 = vpop.f32.mrb[1].mxu1 }
 0x12f   :  { %v148_v35 = vadd.f32 %v188_v28, %v147_v33  ;;  %v158_v36 = vadd.f32 %v188_v28, %v157_v34 }
 0x130   :  { %167 = vst [vmem:[#allocation8 + $0x8] sm:$0xff] %v153_v31  ;;  %169 = vst [vmem:[#allocation8 + $0x18] sm:$0xff] %v163_v32 }
 0x131   :  { %166 = vst [vmem:[#allocation8] sm:$0xff] %v148_v35  ;;  %168 = vst [vmem:[#allocation8 + $0x10] sm:$0xff] %v158_v36 }
 0x132   :  { %378 = shalt.err (!%p375_p0)
}
 0x133   :  { %s379_s28 = scalar_lea.hbm %s488_s3, 512 }
 0x134   :  { %p380_p1 = scmp.ne.s32.totalorder %s488_s3, %s379_s28  ;;  %p383_p2 = scmp.lt.u32.totalorder %s379_s28, %s488_s3 }
 0x136   :  { %p385_p3 = pnand %p383_p2, %p380_p1 }
 0x138   :  { %388 = shalt.err (!%p385_p3)
}
 0x139   :  { %181 = dma.vmem_to_hbm [thread:$0]  %s176_s22, 512, %s488_s3, [#allocation4], %s397_s24, %s397_s24, %s398_s25  }
 0x13a   :  { %393 = dma.done.wait [#allocation4], 512  }
 0x13b   :  { %394 = vsyncadd [#allocation4], 4294966784 }
 0x13c   :  { %185 = vsyncpa [#allocation3], 1 }
 0x13d   :  { %186 = vsyncpa [#allocation6], 1 }
 0x13e   :  { %187 = vsyncpa [#allocation4], 1 }

</bundles_post_ra>
